<compile_context>
chip_gen: v7x
topology: tpu7x:2x2x1
jax: 0.10.0
libtpu: 0.0.40
codegen_flags: <defaults>
</compile_context>

<pallas_src>
import math

import jax
import jax.numpy as jnp
from jax.experimental import pallas as pl
from jax.experimental.pallas import tpu as pltpu

# 256K lanes per step  ->  2 MiB of coordinate input + 1 MiB output HBM traffic
# per grid step (well past the per-step-overhead regime).  With sublane padding
# and default double buffering this is ~32 MiB of VMEM, under the explicit
# 48 MiB limit below (fits v5e/v6e 128 MiB and v7x 64 MiB physical VMEM).
_DEFAULT_TILE_LANES = 256 * 1024


def _dissq_kernel(r2_ref, xy_ref, o_ref):
    # r2 is a scalar held in SMEM (read once); xy is a (2, TILE) lane-dense
    # VMEM block holding the x and y coordinate planes.
    r2 = r2_ref[0]
    x0 = xy_ref[0:1, :].astype(jnp.float32)
    x1 = xy_ref[1:2, :].astype(jnp.float32)
    o_ref[...] = (1.0 - (x0 * x0 + x1 * x1) / r2).astype(o_ref.dtype)


def dissq(x, r, *, tile_lanes=_DEFAULT_TILE_LANES):
    """1 - (x[..., 0:1]**2 + x[..., 1:2]**2) / r**2  (matches Dissq.forward)."""
    lead = x.shape[:-1]
    n = math.prod(lead) if lead else 1
    d = x.shape[-1]

    # Put the point axis on lanes: (2, N).  XLA fuses slice + transpose into a
    # single copy; only 2/D of the tensor is moved.
    xy = jnp.transpose(x.reshape(n, d)[:, 0:2])          # (2, N)

    # Large fixed lane tile (always a multiple of 128); never degenerates.
    # The partial last block (when N % tile != 0) is handled by Pallas, so no
    # padding or post-kernel slicing is needed.
    tile = min(tile_lanes, pl.cdiv(n, 128) * 128)
    grid = (pl.cdiv(n, tile),)

    r2 = (jnp.asarray(r, dtype=jnp.float32) ** 2).reshape((1,))

    out = pl.pallas_call(
        _dissq_kernel,
        out_shape=jax.ShapeDtypeStruct((1, n), x.dtype),
        grid_spec=pltpu.PrefetchScalarGridSpec(
            num_scalar_prefetch=0,
            grid=grid,
            in_specs=[
                pl.BlockSpec(memory_space=pltpu.SMEM),        # r**2 scalar
                pl.BlockSpec((2, tile), lambda i: (0, i)),    # (x, y) planes
            ],
            out_specs=pl.BlockSpec((1, tile), lambda i: (0, i)),
        ),
        compiler_params=pltpu.CompilerParams(
            dimension_semantics=("parallel",),   # lane axis shards across TCs
            vmem_limit_bytes=48 * 1024 * 1024,   # explicit, safe on v5e/v6e/v7x
        ),
    )(r2, xy)

    return out.reshape(lead + (1,))


if __name__ == "__main__":
    key = jax.random.PRNGKey(0)
    # Small batch of 3-D points, consistent with the cylinder-geometry module.
    x = jax.random.normal(key, (2, 4, 16, 3), dtype=jnp.float32)
    r = 0.5  # radius buffer registered in __init__

    y = jax.jit(dissq)(x, r)
    y = jax.block_until_ready(y)

    # Reference (same semantics as the PyTorch forward).
    y_ref = 1.0 - (x[..., 0:1] ** 2 + x[..., 1:2] ** 2) / (jnp.float32(r) ** 2)
    assert y.shape == x.shape[:-1] + (1,) and y.dtype == x.dtype
    assert jnp.allclose(y, y_ref, rtol=1e-5, atol=1e-5), "mismatch vs reference"

    print("KERNEL_OK")
</pallas_src>

<mosaic_0001>
module attributes {stable_mosaic.version = 11 : i64} {
  func.func @_dissq_kernel(%arg0: i32, %arg1: memref<1xf32, #tpu.memory_space<smem>>, %arg2: memref<2x128xf32, #tpu.memory_space<vmem>>, %arg3: memref<1x128xf32, #tpu.memory_space<vmem>>) attributes {dimension_semantics = [#tpu.dimension_semantics<parallel>], iteration_bounds = array<i64: 1>, scalar_prefetch = 0 : i64, scratch_operands = 0 : i64, tpu.core_type = #tpu.core_type<tc>, window_params = [{transform_indices = @transform_0, window_bounds = array<i64: 1>}, {transform_indices = @transform_1, window_bounds = array<i64: 2, 128>}, {transform_indices = @transform_2, window_bounds = array<i64: 1, 128>}]} {
    %c0 = arith.constant 0 : index
    %0 = memref.load %arg1[%c0] : memref<1xf32, #tpu.memory_space<smem>>
    %c0_0 = arith.constant 0 : index
    %c0_1 = arith.constant 0 : index
    %1 = vector.load %arg2[%c0_0, %c0_1] : memref<2x128xf32, #tpu.memory_space<vmem>>, vector<1x128xf32>
    %c1 = arith.constant 1 : index
    %c0_2 = arith.constant 0 : index
    %2 = vector.load %arg2[%c1, %c0_2] : memref<2x128xf32, #tpu.memory_space<vmem>>, vector<1x128xf32>
    %3 = arith.mulf %1, %1 : vector<1x128xf32>
    %4 = arith.mulf %2, %2 : vector<1x128xf32>
    %5 = arith.addf %3, %4 : vector<1x128xf32>
    %6 = vector.broadcast %0 : f32 to vector<1x128xf32>
    %7 = arith.divf %5, %6 : vector<1x128xf32>
    %cst = arith.constant 1.000000e+00 : f32
    %8 = vector.broadcast %cst : f32 to vector<1x128xf32>
    %9 = arith.subf %8, %7 : vector<1x128xf32>
    %c0_3 = arith.constant 0 : index
    %c0_4 = arith.constant 0 : index
    %10 = vector.load %arg3[%c0_3, %c0_4] : memref<1x128xf32, #tpu.memory_space<vmem>>, vector<1x128xf32>
    tpu.vector_store %arg3[%c0_3, %c0_4], %9 {strides = array<i32>} : memref<1x128xf32, #tpu.memory_space<vmem>>, vector<1x128xf32>,
    return
  }
  func.func @transform_0(%arg0: i32) -> i32 {
    %c0_i32 = arith.constant 0 : i32
    %c0_i32_0 = arith.constant 0 : i32
    return %c0_i32 : i32
  }
  func.func @transform_1(%arg0: i32) -> (i32, i32) {
    %c0_i32 = arith.constant 0 : i32
    %c0_i32_0 = arith.constant 0 : i32
    return %c0_i32, %arg0 : i32, i32
  }
  func.func @transform_2(%arg0: i32) -> (i32, i32) {
    %c0_i32 = arith.constant 0 : i32
    %c0_i32_0 = arith.constant 0 : i32
    return %c0_i32, %arg0 : i32, i32
  }
}

</mosaic_0001>

<bundles_post_ra>
// kernel: dissq.1
= control target key start
LH: loop header
LB: loop body
LE: loop exit
PB: predicated region body
PF: predicated region fallthrough
CT: control target
= control target key end

     0   :  { %s56_s0 = inlined_call_operand.<no memory space> [shape: f32[1], index: 0, kind: input, shape index: {}]   ;;  %s57_s1 = inlined_call_operand.vmem [shape: f32[2,128], index: 1, kind: input, shape index: {}]   ;;  %s58_s2 = inlined_call_operand.vmem [shape: f32[1,128], index: 2, kind: output, shape index: {}]  }
   0x1   :  { %v18_v0 = vstv %s56_s0  ;;  %v13_v1 = vld [vmem:[%s57_s1] sm:$0x1]  ;;  %v14_v2 = vld [vmem:[%s57_s1 + $0x1] sm:$0x1] }
   0x2   :  { %27 = vrcp.f32 %v18_v0  ;;  %v15_v3 = vmul.f32 %v13_v1, %v13_v1  ;;  %v16_v4 = vmul.f32 %v14_v2, %v14_v2 }
   0x4   :  { %v17_v5 = vadd.f32 %v16_v4, %v15_v3 }
   0xc   :  { %v28_v6 = vpop.eup %27 }
   0xd   :  { %v20_v7 = vmul.f32 %v28_v6, %v17_v5 }
   0xf   :  { %v21_v8 = vsub.f32 1.0, %v20_v7 }
  0x11   :  { %22 = vst [vmem:[%s58_s2] sm:$0x1] %v21_v8 }

</bundles_post_ra>
